<compile_context>
chip_gen: v5e
topology: v5e:2x2
jax: 0.10.0
libtpu: 0.0.40
codegen_flags: <defaults>
</compile_context>

<pallas_src>
import jax
import jax.numpy as jnp
from jax.experimental import pallas as pl
from jax.experimental.pallas import tpu as pltpu


def _scale_mul_kernel(x_ref, s_ref, o_ref):
    # x_ref: (tr, hw) block; s_ref: (rows_pad, 1) resident scale (DMA'd once);
    # o_ref: (tr, hw) block. Slice this block's rows of the scale and broadcast
    # over lanes on the VPU.
    tr = x_ref.shape[0]
    start = pl.multiple_of(pl.program_id(0) * tr, 8)
    s = s_ref[pl.ds(start, tr), :]
    o_ref[...] = (x_ref[...] * s).astype(o_ref.dtype)


def _pick_row_tile(rows):
    # Launch-/step-overhead bound: target at most 2 grid steps
    # (one block per TensorCore on v7x; 1-2 cheap serial steps on v5e/v6e).
    if rows <= 8:
        return rows
    half = (rows + 1) // 2
    tr = ((half + 7) // 8) * 8  # sublane multiple of 8
    return min(tr, rows)


def channel_scale_mul(x, scale):
    """x: (N, C, H, W), scale: (N, C, 1, 1) -> (N, C, H, W), elementwise x * scale."""
    N, C, H, W = x.shape
    assert scale.shape == (N, C, 1, 1)
    rows = N * C
    hw = H * W

    x2 = x.reshape(rows, hw)                     # contiguous view, no copy
    s2 = scale.reshape(rows, 1).astype(x.dtype)  # keep multiply in input dtype

    tr = _pick_row_tile(rows)
    grid_rows = pl.cdiv(rows, tr)

    # Pad the (tiny) scale rows to grid*tr so the in-kernel dynamic slice of the
    # resident scale buffer is always in-bounds. No-op for the canonical shape
    # (rows=480, tr=240).
    rows_pad = grid_rows * tr
    if rows_pad != rows:
        s2 = jnp.pad(s2, ((0, rows_pad - rows), (0, 0)))

    out2 = pl.pallas_call(
        _scale_mul_kernel,
        out_shape=jax.ShapeDtypeStruct((rows, hw), x.dtype),
        grid=(grid_rows,),
        in_specs=[
            pl.BlockSpec((tr, hw), lambda i: (i, 0)),
            # Resident scale: constant block index => single DMA, stays in VMEM.
            pl.BlockSpec((rows_pad, 1), lambda i: (0, 0)),
        ],
        out_specs=pl.BlockSpec((tr, hw), lambda i: (i, 0)),
        compiler_params=pltpu.CompilerParams(
            dimension_semantics=("parallel",),
        ),
    )(x2, s2)

    return out2.reshape(N, C, H, W)


if __name__ == "__main__":
    key = jax.random.PRNGKey(0)
    k1, k2 = jax.random.split(key)

    # Shapes implied by the module's forward:
    #   x108: (1, 480, 14, 14), x113: (1, 480, 1, 1)
    x108 = jax.random.normal(k1, (1, 480, 14, 14), dtype=jnp.float32)
    x113 = jax.random.normal(k2, (1, 480, 1, 1), dtype=jnp.float32)

    out = channel_scale_mul(x108, x113)
    out = jax.block_until_ready(out)

    # Reference: plain JAX broadcasting (== PyTorch operator.mul semantics)
    ref = x108 * x113
    assert out.shape == (1, 480, 14, 14)
    assert jnp.allclose(out, ref, atol=1e-6, rtol=1e-6)

    print("KERNEL_OK")
</pallas_src>

<mosaic_0001>
module attributes {stable_mosaic.version = 11 : i64} {
  func.func @_scale_mul_kernel(%arg0: i32, %arg1: memref<240x196xf32, #tpu.memory_space<vmem>>, %arg2: memref<480x1xf32, #tpu.memory_space<vmem>>, %arg3: memref<240x196xf32, #tpu.memory_space<vmem>>) attributes {dimension_semantics = [#tpu.dimension_semantics<parallel>], iteration_bounds = array<i64: 2>, scalar_prefetch = 0 : i64, scratch_operands = 0 : i64, tpu.core_type = #tpu.core_type<tc>, window_params = [{transform_indices = @transform_0, window_bounds = array<i64: 240, 196>}, {pipeline_mode = #tpu.pipeline_mode<synchronous>, transform_indices = @transform_1, window_bounds = array<i64: 480, 1>}, {transform_indices = @transform_2, window_bounds = array<i64: 240, 196>}]} {
    %c240_i32 = arith.constant 240 : i32
    %0 = arith.muli %arg0, %c240_i32 : i32
    %1 = tpu.assume_multiple %0, 8 : i32
    %2 = arith.index_cast %1 : i32 to index
    %c0 = arith.constant 0 : index
    %3 = vector.load %arg2[%2, %c0] : memref<480x1xf32, #tpu.memory_space<vmem>>, vector<240x1xf32>
    %c0_0 = arith.constant 0 : index
    %c0_1 = arith.constant 0 : index
    %4 = vector.load %arg1[%c0_0, %c0_1] : memref<240x196xf32, #tpu.memory_space<vmem>>, vector<240x196xf32>
    %5 = vector.broadcast %3 : vector<240x1xf32> to vector<240x196xf32>
    %6 = arith.mulf %4, %5 : vector<240x196xf32>
    %c0_2 = arith.constant 0 : index
    %c0_3 = arith.constant 0 : index
    %7 = vector.load %arg3[%c0_2, %c0_3] : memref<240x196xf32, #tpu.memory_space<vmem>>, vector<240x196xf32>
    tpu.vector_store %arg3[%c0_2, %c0_3], %6 {strides = array<i32>} : memref<240x196xf32, #tpu.memory_space<vmem>>, vector<240x196xf32>,
    return
  }
  func.func @transform_0(%arg0: i32) -> (i32, i32) {
    %c0_i32 = arith.constant 0 : i32
    %c0_i32_0 = arith.constant 0 : i32
    return %arg0, %c0_i32 : i32, i32
  }
  func.func @transform_1(%arg0: i32) -> (i32, i32) {
    %c0_i32 = arith.constant 0 : i32
    %c0_i32_0 = arith.constant 0 : i32
    %c0_i32_1 = arith.constant 0 : i32
    return %c0_i32, %c0_i32_0 : i32, i32
  }
  func.func @transform_2(%arg0: i32) -> (i32, i32) {
    %c0_i32 = arith.constant 0 : i32
    %c0_i32_0 = arith.constant 0 : i32
    return %arg0, %c0_i32 : i32, i32
  }
}

</mosaic_0001>

<bundles_post_ra>
// kernel: tpu_custom_call.1
= control target key start
LH: loop header
LB: loop body
LE: loop exit
PB: predicated region body
PF: predicated region fallthrough
CT: control target
= control target key end

     0   :  { %s624_s9 = smov 0   ;;  %s834_s0 = inlined_call_operand.vmem [shape: f32[480,196], index: 0, kind: input, shape index: {}]   ;;  %s835_s1 = inlined_call_operand.vmem [shape: f32[480,1], index: 1, kind: input, shape index: {}]   ;;  %s836_s2 = inlined_call_operand.vmem [shape: f32[480,196], index: 2, kind: output, shape index: {}]  }
   0x1 LB: > { %s575_s10 = sadd.s32 4294967295, %s606_s9   ;;  %p579_p0 = scmp.ge.s32.totalorder %s606_s9, 1  ;;  %s606_s9 = sphi %s624_s9, %s12_s9  }
   0x2   : > { %p114_p1 = scmp.lt.s32.totalorder %s606_s9, 3 }
   0x4   : > { %p115_p2 = pnand %p579_p0, %p114_p1 }
   0x5   : > { %s152_s11 = smul.u32 (!%p115_p2), 240, %s575_s10 }
   0x6   : > { %118 = sbr.rel (%p115_p2) target bundleno = 207 (0xcf), region = 28 }
   0x7   : > { %s637_s14 = scalar_lea.vmem (!%p115_p2), %s835_s1, %s152_s11  ;;  %s138_s15 = smul.u32 (!%p115_p2), 30, %s575_s10 }
   0x9   : > { %p139_p3 = scmp.lt.s32.totalorder (!%p115_p2), %s138_s15, 59 }
   0xb   : > { %v608_v0 = vmov 0   ;;  %v158_v1 = vld [vmem:[%s637_s14 + $0x20] sm:$0xff]  ;;  %v156_v2 = vld [vmem:[%s637_s14 + $0x10] sm:$0xff]  ;;  %v159_v4 = vld [vmem:[%s637_s14 + $0x28] sm:$0xff]  ;;  %s838_s15 = smov (!%p139_p3, %s138_s15), 59  ;;  %vm455_vm0 = vcmask 556032  }
   0xc   : > { %599 = vset.pattern.permute.xlu2 %v608_v0  ;;  %598 = vset.pattern.permute.xlu1 %v608_v0  ;;  %v154_v3 = vld [vmem:[%s637_s14] sm:$0xff]  ;;  %v157_v5 = vld [vmem:[%s637_s14 + $0x18] sm:$0xff]  ;;  %v155_v6 = vld [vmem:[%s637_s14 + $0x8] sm:$0xff]  ;;  %s586_s16 = sshll.u32 %s838_s15, 4 }
   0xd   : > { %597 = vset.pattern.permute.xlu0 %v608_v0  ;;  %266 = vperm.xlu2 %599, %v158_v1   ;;  %v162_v7 = vld [vmem:[%s637_s14 + $0x40] sm:$0xff]  ;;  %v161_v8 = vld [vmem:[%s637_s14 + $0x38] sm:$0xff]  ;;  %v160_v9 = vld [vmem:[%s637_s14 + $0x30] sm:$0xff]  ;;  %s674_s19 = scalar_lea.vmem %s834_s0, %s586_s16  ;;  %s681_s22 = scalar_lea.vmem %s836_s2, %s586_s16 }
   0xe   : > { %256 = vperm.xlu1 %598, %v156_v2   ;;  %246 = vperm.xlu0 %597, %v154_v3   ;;  %v165_v10 = vld [vmem:[%s637_s14 + $0x58] sm:$0xff]  ;;  %v164_v11 = vld [vmem:[%s637_s14 + $0x50] sm:$0xff]  ;;  %v163_v12 = vld [vmem:[%s637_s14 + $0x48] sm:$0xff] }
   0xf   : > { %v168_v13 = vld [vmem:[%s637_s14 + $0x70] sm:$0xff]  ;;  %v167_v14 = vld [vmem:[%s637_s14 + $0x68] sm:$0xff]  ;;  %v166_v15 = vld [vmem:[%s637_s14 + $0x60] sm:$0xff] }
  0x10   : > { %v171_v16 = vld [vmem:[%s637_s14 + $0x88] sm:$0xff]  ;;  %v170_v17 = vld [vmem:[%s637_s14 + $0x80] sm:$0xff]  ;;  %v169_v18 = vld [vmem:[%s637_s14 + $0x78] sm:$0xff] }
  0x11   : > { %v174_v19 = vld [vmem:[%s637_s14 + $0xa0] sm:$0xff]  ;;  %v173_v20 = vld [vmem:[%s637_s14 + $0x98] sm:$0xff]  ;;  %v172_v21 = vld [vmem:[%s637_s14 + $0x90] sm:$0xff] }
  0x12   : > { %v177_v22 = vld [vmem:[%s637_s14 + $0xb8] sm:$0xff]  ;;  %v176_v23 = vld [vmem:[%s637_s14 + $0xb0] sm:$0xff]  ;;  %v175_v24 = vld [vmem:[%s637_s14 + $0xa8] sm:$0xff] }
  0x13   : > { %v180_v25 = vld [vmem:[%s637_s14 + $0xd0] sm:$0xff]  ;;  %v179_v26 = vld [vmem:[%s637_s14 + $0xc8] sm:$0xff]  ;;  %v178_v27 = vld [vmem:[%s637_s14 + $0xc0] sm:$0xff] }
  0x14   : > { %v183_v28 = vld [vmem:[%s637_s14 + $0xe8] sm:$0xff]  ;;  %v182_v29 = vld [vmem:[%s637_s14 + $0xe0] sm:$0xff]  ;;  %v181_v30 = vld [vmem:[%s637_s14 + $0xd8] sm:$0xff] }
  0x15   : > { %271 = vperm.xlu2 %599, %v159_v4   ;;  %v192_v31 = vld [vmem:[%s674_s19 + $0x40] sm:$0xff]  ;;  %v193_v32 = vld [vmem:[%s674_s19 + $0x48] sm:$0xff]  ;;  %v194_v36 = vld [vmem:[%s674_s19 + $0x50] sm:$0xff] }
  0x16   : > { %261 = vperm.xlu1 %598, %v157_v5   ;;  %251 = vperm.xlu0 %597, %v155_v6   ;;  %v195_v37 = vld [vmem:[%s674_s19 + $0x58] sm:$0xff]  ;;  %v200_v41 = vld [vmem:[%s674_s19 + $0x80] sm:$0xff]  ;;  %v201_v42 = vld [vmem:[%s674_s19 + $0x88] sm:$0xff] }
  0x17   : > { %v206_v46 = vld [vmem:[%s674_s19 + $0xb0] sm:$0xff]  ;;  %v207_v47 = vld [vmem:[%s674_s19 + $0xb8] sm:$0xff]  ;;  %v188_v48 = vld [vmem:[%s674_s19 + $0x20] sm:$0xff] }
  0x18   : > { %v189_v49 = vld [vmem:[%s674_s19 + $0x28] sm:$0xff]  ;;  %v184_v52 = vld [vmem:[%s674_s19] sm:$0xff]  ;;  %v190_v63 = vld [vmem:[%s674_s19 + $0x30] sm:$0xff] }
  0x19   : > { %v185_v57 = vld [vmem:[%s674_s19 + $0x8] sm:$0xff]  ;;  %v212_v61 = vld [vmem:[%s674_s19 + $0xe0] sm:$0xff]  ;;  %v191_v0 = vld [vmem:[%s674_s19 + $0x38] sm:$0xff] }
  0x1a   : > { %v213_v62 = vld [vmem:[%s674_s19 + $0xe8] sm:$0xff]  ;;  %v186_v3 = vld [vmem:[%s674_s19 + $0x10] sm:$0xff] }
  0x1d   : > { %286 = vperm.xlu2 %599, %v162_v7  }
  0x1e   : > { %281 = vperm.xlu1 %598, %v161_v8   ;;  %276 = vperm.xlu0 %597, %v160_v9   ;;  %v187_v8 = vld [vmem:[%s674_s19 + $0x18] sm:$0xff] }
  0x25   : > { %301 = vperm.xlu2 %599, %v165_v10  }
  0x26   : > { %296 = vperm.xlu1 %598, %v164_v11   ;;  %291 = vperm.xlu0 %597, %v163_v12   ;;  %v218_v12 = vld [vmem:[%s674_s19 + $0x110] sm:$0xff] }
  0x2d   : > { %316 = vperm.xlu2 %599, %v168_v13   ;;  %v219_v13 = vld [vmem:[%s674_s19 + $0x118] sm:$0xff] }
  0x2e   : > { %311 = vperm.xlu1 %598, %v167_v14   ;;  %306 = vperm.xlu0 %597, %v166_v15   ;;  %v198_v14 = vld [vmem:[%s674_s19 + $0x70] sm:$0xff]  ;;  %v199_v15 = vld [vmem:[%s674_s19 + $0x78] sm:$0xff] }
  0x35   : > { %331 = vperm.xlu2 %599, %v171_v16  }
  0x36   : > { %326 = vperm.xlu1 %598, %v170_v17   ;;  %321 = vperm.xlu0 %597, %v169_v18   ;;  %v196_v18 = vld [vmem:[%s674_s19 + $0x60] sm:$0xff] }
  0x3d   : > { %346 = vperm.xlu2 %599, %v174_v19  }
  0x3e   : > { %341 = vperm.xlu1 %598, %v173_v20   ;;  %336 = vperm.xlu0 %597, %v172_v21  }
  0x45   : > { %361 = vperm.xlu2 %599, %v177_v22  }
  0x46   : > { %356 = vperm.xlu1 %598, %v176_v23   ;;  %351 = vperm.xlu0 %597, %v175_v24   ;;  %v197_v23 = vld [vmem:[%s674_s19 + $0x68] sm:$0xff] }
  0x4d   : > { %376 = vperm.xlu2 %599, %v180_v25  }
  0x4e   : > { %371 = vperm.xlu1 %598, %v179_v26   ;;  %366 = vperm.xlu0 %597, %v178_v27   ;;  %v224_v27 = vld [vmem:[%s674_s19 + $0x140] sm:$0xff] }
  0x55   : > { %391 = vperm.xlu2 %599, %v183_v28   ;;  %v225_v28 = vld [vmem:[%s674_s19 + $0x148] sm:$0xff] }
  0x56   : > { %386 = vperm.xlu1 %598, %v182_v29   ;;  %381 = vperm.xlu0 %597, %v181_v30   ;;  %v204_v29 = vld [vmem:[%s674_s19 + $0xa0] sm:$0xff]  ;;  %v205_v30 = vld [vmem:[%s674_s19 + $0xa8] sm:$0xff] }
  0x67   : > { %v267_v33 = vpop.permute.xlu2 %266 }
  0x68   : > { %v402_v34 = vmul.f32 %v267_v33, %v192_v31  ;;  %v403_v35 = vmul.f32 %v267_v33, %v193_v32  ;;  %v202_v33 = vld [vmem:[%s674_s19 + $0x90] sm:$0xff] }
  0x6a   : > { %463 = vst [vmem:[%s681_s22 + $0x40] sm:$0xff] %v402_v34 }
  0x6b   : > { %464 = vst.msk [vmem:[%s681_s22 + $0x48] sm:$0xff] %vm455_vm0, %v403_v35 }
  0x6f   : > { %v272_v38 = vpop.permute.xlu2 %271 }
  0x70   : > { %v404_v39 = vmul.f32 %v272_v38, %v194_v36  ;;  %v405_v40 = vmul.f32 %v272_v38, %v195_v37  ;;  %v203_v38 = vld [vmem:[%s674_s19 + $0x98] sm:$0xff] }
  0x72   : > { %465 = vst [vmem:[%s681_s22 + $0x50] sm:$0xff] %v404_v39 }
  0x73   : > { %466 = vst.msk [vmem:[%s681_s22 + $0x58] sm:$0xff] %vm455_vm0, %v405_v40 }
  0x77   : > { %v287_v43 = vpop.permute.xlu2 %286 }
  0x78   : > { %v410_v44 = vmul.f32 %v287_v43, %v200_v41  ;;  %v411_v45 = vmul.f32 %v287_v43, %v201_v42  ;;  %v230_v42 = vld [vmem:[%s674_s19 + $0x170] sm:$0xff]  ;;  %v231_v43 = vld [vmem:[%s674_s19 + $0x178] sm:$0xff] }
  0x7a   : > { %471 = vst [vmem:[%s681_s22 + $0x80] sm:$0xff] %v410_v44  ;;  %v210_v44 = vld [vmem:[%s674_s19 + $0xd0] sm:$0xff] }
  0x7b   : > { %472 = vst.msk [vmem:[%s681_s22 + $0x88] sm:$0xff] %vm455_vm0, %v411_v45  ;;  %v211_v45 = vld [vmem:[%s674_s19 + $0xd8] sm:$0xff] }
  0x7f   : > { %v302_v50 = vpop.permute.xlu2 %301 }
  0x80   : > { %v257_v51 = vpop.permute.xlu1 %256  ;;  %v416_v53 = vmul.f32 %v302_v50, %v206_v46  ;;  %v417_v54 = vmul.f32 %v302_v50, %v207_v47  ;;  %v247_v56 = vpop.permute.xlu0 %246 }
  0x81   : > { %v398_v55 = vmul.f32 %v257_v51, %v188_v48  ;;  %v399_v58 = vmul.f32 %v257_v51, %v189_v49  ;;  %v394_v59 = vmul.f32 %v247_v56, %v184_v52  ;;  %v395_v60 = vmul.f32 %v247_v56, %v185_v57  ;;  %v208_v48 = vld [vmem:[%s674_s19 + $0xc0] sm:$0xff] }
  0x82   : > { %477 = vst [vmem:[%s681_s22 + $0xb0] sm:$0xff] %v416_v53  ;;  %v209_v53 = vld [vmem:[%s674_s19 + $0xc8] sm:$0xff]  ;;  %v236_v57 = vld [vmem:[%s674_s19 + $0x1a0] sm:$0xff] }
  0x83   : > { %478 = vst.msk [vmem:[%s681_s22 + $0xb8] sm:$0xff] %vm455_vm0, %v417_v54 }
  0x84   : > { %459 = vst [vmem:[%s681_s22 + $0x20] sm:$0xff] %v398_v55 }
  0x85   : > { %460 = vst.msk [vmem:[%s681_s22 + $0x28] sm:$0xff] %vm455_vm0, %v399_v58  ;;  %v237_v58 = vld [vmem:[%s674_s19 + $0x1a8] sm:$0xff] }
  0x86   : > { %454 = vst [vmem:[%s681_s22] sm:$0xff] %v394_v59  ;;  %v216_v59 = vld [vmem:[%s674_s19 + $0x100] sm:$0xff] }
  0x87   : > { %456 = vst.msk [vmem:[%s681_s22 + $0x8] sm:$0xff] %vm455_vm0, %v395_v60  ;;  %v317_v1 = vpop.permute.xlu2 %316  ;;  %v217_v60 = vld [vmem:[%s674_s19 + $0x108] sm:$0xff] }
  0x88   : > { %v262_v2 = vpop.permute.xlu1 %261  ;;  %v422_v4 = vmul.f32 %v317_v1, %v212_v61  ;;  %v423_v5 = vmul.f32 %v317_v1, %v213_v62  ;;  %v252_v7 = vpop.permute.xlu0 %251 }
  0x89   : > { %v400_v6 = vmul.f32 %v262_v2, %v190_v63  ;;  %v401_v9 = vmul.f32 %v262_v2, %v191_v0  ;;  %v396_v10 = vmul.f32 %v252_v7, %v186_v3  ;;  %v397_v11 = vmul.f32 %v252_v7, %v187_v8  ;;  %v214_v63 = vld [vmem:[%s674_s19 + $0xf0] sm:$0xff] }
  0x8a   : > { %483 = vst [vmem:[%s681_s22 + $0xe0] sm:$0xff] %v422_v4  ;;  %v215_v4 = vld [vmem:[%s674_s19 + $0xf8] sm:$0xff]  ;;  %v242_v8 = vld [vmem:[%s674_s19 + $0x1d0] sm:$0xff] }
  0x8b   : > { %484 = vst.msk [vmem:[%s681_s22 + $0xe8] sm:$0xff] %vm455_vm0, %v423_v5 }
  0x8c   : > { %461 = vst [vmem:[%s681_s22 + $0x30] sm:$0xff] %v400_v6 }
  0x8d   : > { %462 = vst.msk [vmem:[%s681_s22 + $0x38] sm:$0xff] %vm455_vm0, %v401_v9  ;;  %v243_v9 = vld [vmem:[%s674_s19 + $0x1d8] sm:$0xff] }
  0x8e   : > { %457 = vst [vmem:[%s681_s22 + $0x10] sm:$0xff] %v396_v10  ;;  %v222_v10 = vld [vmem:[%s674_s19 + $0x130] sm:$0xff] }
  0x8f   : > { %458 = vst.msk [vmem:[%s681_s22 + $0x18] sm:$0xff] %vm455_vm0, %v397_v11  ;;  %v332_v16 = vpop.permute.xlu2 %331  ;;  %v223_v11 = vld [vmem:[%s674_s19 + $0x138] sm:$0xff] }
  0x90   : > { %v282_v17 = vpop.permute.xlu1 %281  ;;  %v428_v19 = vmul.f32 %v332_v16, %v218_v12  ;;  %v429_v20 = vmul.f32 %v332_v16, %v219_v13  ;;  %v277_v22 = vpop.permute.xlu0 %276 }
  0x91   : > { %v408_v21 = vmul.f32 %v282_v17, %v198_v14  ;;  %v409_v24 = vmul.f32 %v282_v17, %v199_v15  ;;  %v406_v25 = vmul.f32 %v277_v22, %v196_v18  ;;  %v407_v26 = vmul.f32 %v277_v22, %v197_v23  ;;  %v220_v14 = vld [vmem:[%s674_s19 + $0x120] sm:$0xff] }
  0x92   : > { %489 = vst [vmem:[%s681_s22 + $0x110] sm:$0xff] %v428_v19  ;;  %v221_v19 = vld [vmem:[%s674_s19 + $0x128] sm:$0xff]  ;;  %v228_v23 = vld [vmem:[%s674_s19 + $0x160] sm:$0xff] }
  0x93   : > { %490 = vst.msk [vmem:[%s681_s22 + $0x118] sm:$0xff] %vm455_vm0, %v429_v20 }
  0x94   : > { %469 = vst [vmem:[%s681_s22 + $0x70] sm:$0xff] %v408_v21 }
  0x95   : > { %470 = vst.msk [vmem:[%s681_s22 + $0x78] sm:$0xff] %vm455_vm0, %v409_v24  ;;  %v229_v24 = vld [vmem:[%s674_s19 + $0x168] sm:$0xff] }
  0x96   : > { %467 = vst [vmem:[%s681_s22 + $0x60] sm:$0xff] %v406_v25  ;;  %v226_v25 = vld [vmem:[%s674_s19 + $0x150] sm:$0xff] }
  0x97   : > { %468 = vst.msk [vmem:[%s681_s22 + $0x68] sm:$0xff] %vm455_vm0, %v407_v26  ;;  %v347_v31 = vpop.permute.xlu2 %346  ;;  %v227_v26 = vld [vmem:[%s674_s19 + $0x158] sm:$0xff] }
  0x98   : > { %v297_v32 = vpop.permute.xlu1 %296  ;;  %v434_v34 = vmul.f32 %v347_v31, %v224_v27  ;;  %v435_v35 = vmul.f32 %v347_v31, %v225_v28  ;;  %v292_v37 = vpop.permute.xlu0 %291 }
  0x99   : > { %v414_v36 = vmul.f32 %v297_v32, %v204_v29  ;;  %v415_v39 = vmul.f32 %v297_v32, %v205_v30  ;;  %v412_v40 = vmul.f32 %v292_v37, %v202_v33  ;;  %v413_v41 = vmul.f32 %v292_v37, %v203_v38  ;;  %v234_v33 = vld [vmem:[%s674_s19 + $0x190] sm:$0xff] }
  0x9a   : > { %495 = vst [vmem:[%s681_s22 + $0x140] sm:$0xff] %v434_v34  ;;  %v235_v34 = vld [vmem:[%s674_s19 + $0x198] sm:$0xff] }
  0x9b   : > { %496 = vst.msk [vmem:[%s681_s22 + $0x148] sm:$0xff] %vm455_vm0, %v435_v35  ;;  %v232_v35 = vld [vmem:[%s674_s19 + $0x180] sm:$0xff] }
  0x9c   : > { %475 = vst [vmem:[%s681_s22 + $0xa0] sm:$0xff] %v414_v36  ;;  %v233_v36 = vld [vmem:[%s674_s19 + $0x188] sm:$0xff] }
  0x9d   : > { %476 = vst.msk [vmem:[%s681_s22 + $0xa8] sm:$0xff] %vm455_vm0, %v415_v39 }
  0x9e   : > { %473 = vst [vmem:[%s681_s22 + $0x90] sm:$0xff] %v412_v40 }
  0x9f   : > { %474 = vst.msk [vmem:[%s681_s22 + $0x98] sm:$0xff] %vm455_vm0, %v413_v41  ;;  %v362_v46 = vpop.permute.xlu2 %361 }
  0xa0   : > { %v312_v47 = vpop.permute.xlu1 %311  ;;  %v440_v49 = vmul.f32 %v362_v46, %v230_v42  ;;  %v441_v50 = vmul.f32 %v362_v46, %v231_v43  ;;  %v307_v52 = vpop.permute.xlu0 %306  ;;  %v240_v43 = vld [vmem:[%s674_s19 + $0x1c0] sm:$0xff]  ;;  %v239_v46 = vld [vmem:[%s674_s19 + $0x1b8] sm:$0xff] }
  0xa1   : > { %v420_v51 = vmul.f32 %v312_v47, %v210_v44  ;;  %v421_v54 = vmul.f32 %v312_v47, %v211_v45  ;;  %v418_v55 = vmul.f32 %v307_v52, %v208_v48  ;;  %v419_v56 = vmul.f32 %v307_v52, %v209_v53  ;;  %v241_v44 = vld [vmem:[%s674_s19 + $0x1c8] sm:$0xff]  ;;  %v238_v45 = vld [vmem:[%s674_s19 + $0x1b0] sm:$0xff] }
  0xa2   : > { %501 = vst [vmem:[%s681_s22 + $0x170] sm:$0xff] %v440_v49 }
  0xa3   : > { %502 = vst.msk [vmem:[%s681_s22 + $0x178] sm:$0xff] %vm455_vm0, %v441_v50 }
  0xa4   : > { %481 = vst [vmem:[%s681_s22 + $0xd0] sm:$0xff] %v420_v51 }
  0xa5   : > { %482 = vst.msk [vmem:[%s681_s22 + $0xd8] sm:$0xff] %vm455_vm0, %v421_v54 }
  0xa6   : > { %479 = vst [vmem:[%s681_s22 + $0xc0] sm:$0xff] %v418_v55 }
  0xa7   : > { %480 = vst.msk [vmem:[%s681_s22 + $0xc8] sm:$0xff] %vm455_vm0, %v419_v56  ;;  %v377_v61 = vpop.permute.xlu2 %376 }
  0xa8   : > { %v327_v62 = vpop.permute.xlu1 %326  ;;  %v446_v0 = vmul.f32 %v377_v61, %v236_v57  ;;  %v447_v1 = vmul.f32 %v377_v61, %v237_v58  ;;  %v322_v3 = vpop.permute.xlu0 %321 }
  0xa9   : > { %v426_v2 = vmul.f32 %v327_v62, %v216_v59  ;;  %v427_v5 = vmul.f32 %v327_v62, %v217_v60  ;;  %v424_v6 = vmul.f32 %v322_v3, %v214_v63  ;;  %v425_v7 = vmul.f32 %v322_v3, %v215_v4 }
  0xaa   : > { %507 = vst [vmem:[%s681_s22 + $0x1a0] sm:$0xff] %v446_v0 }
  0xab   : > { %508 = vst.msk [vmem:[%s681_s22 + $0x1a8] sm:$0xff] %vm455_vm0, %v447_v1 }
  0xac   : > { %487 = vst [vmem:[%s681_s22 + $0x100] sm:$0xff] %v426_v2 }
  0xad   : > { %488 = vst.msk [vmem:[%s681_s22 + $0x108] sm:$0xff] %vm455_vm0, %v427_v5 }
  0xae   : > { %485 = vst [vmem:[%s681_s22 + $0xf0] sm:$0xff] %v424_v6 }
  0xaf   : > { %486 = vst.msk [vmem:[%s681_s22 + $0xf8] sm:$0xff] %vm455_vm0, %v425_v7  ;;  %v392_v12 = vpop.permute.xlu2 %391 }
  0xb0   : > { %v342_v13 = vpop.permute.xlu1 %341  ;;  %v452_v15 = vmul.f32 %v392_v12, %v242_v8  ;;  %v453_v16 = vmul.f32 %v392_v12, %v243_v9  ;;  %v337_v18 = vpop.permute.xlu0 %336 }
  0xb1   : > { %v432_v17 = vmul.f32 %v342_v13, %v222_v10  ;;  %v433_v20 = vmul.f32 %v342_v13, %v223_v11  ;;  %v430_v21 = vmul.f32 %v337_v18, %v220_v14  ;;  %v431_v22 = vmul.f32 %v337_v18, %v221_v19 }
  0xb2   : > { %513 = vst [vmem:[%s681_s22 + $0x1d0] sm:$0xff] %v452_v15 }
  0xb3   : > { %514 = vst.msk [vmem:[%s681_s22 + $0x1d8] sm:$0xff] %vm455_vm0, %v453_v16 }
  0xb4   : > { %493 = vst [vmem:[%s681_s22 + $0x130] sm:$0xff] %v432_v17 }
  0xb5   : > { %494 = vst.msk [vmem:[%s681_s22 + $0x138] sm:$0xff] %vm455_vm0, %v433_v20 }
  0xb6   : > { %491 = vst [vmem:[%s681_s22 + $0x120] sm:$0xff] %v430_v21 }
  0xb7   : > { %492 = vst.msk [vmem:[%s681_s22 + $0x128] sm:$0xff] %vm455_vm0, %v431_v22 }
  0xb8   : > { %v357_v27 = vpop.permute.xlu1 %356  ;;  %v352_v30 = vpop.permute.xlu0 %351 }
  0xb9   : > { %v438_v28 = vmul.f32 %v357_v27, %v228_v23  ;;  %v439_v29 = vmul.f32 %v357_v27, %v229_v24  ;;  %v436_v31 = vmul.f32 %v352_v30, %v226_v25  ;;  %v437_v32 = vmul.f32 %v352_v30, %v227_v26 }
  0xbb   : > { %499 = vst [vmem:[%s681_s22 + $0x160] sm:$0xff] %v438_v28 }
  0xbc   : > { %500 = vst.msk [vmem:[%s681_s22 + $0x168] sm:$0xff] %vm455_vm0, %v439_v29 }
  0xbd   : > { %497 = vst [vmem:[%s681_s22 + $0x150] sm:$0xff] %v436_v31 }
  0xbe   : > { %498 = vst.msk [vmem:[%s681_s22 + $0x158] sm:$0xff] %vm455_vm0, %v437_v32 }
  0xc0   : > { %v372_v37 = vpop.permute.xlu1 %371  ;;  %v367_v40 = vpop.permute.xlu0 %366 }
  0xc1   : > { %v444_v38 = vmul.f32 %v372_v37, %v234_v33  ;;  %v445_v39 = vmul.f32 %v372_v37, %v235_v34  ;;  %v442_v41 = vmul.f32 %v367_v40, %v232_v35  ;;  %v443_v42 = vmul.f32 %v367_v40, %v233_v36 }
  0xc3   : > { %505 = vst [vmem:[%s681_s22 + $0x190] sm:$0xff] %v444_v38 }
  0xc4   : > { %506 = vst.msk [vmem:[%s681_s22 + $0x198] sm:$0xff] %vm455_vm0, %v445_v39 }
  0xc5   : > { %503 = vst [vmem:[%s681_s22 + $0x180] sm:$0xff] %v442_v41 }
  0xc6   : > { %504 = vst.msk [vmem:[%s681_s22 + $0x188] sm:$0xff] %vm455_vm0, %v443_v42 }
  0xc8   : > { %v387_v47 = vpop.permute.xlu1 %386  ;;  %v382_v50 = vpop.permute.xlu0 %381 }
  0xc9   : > { %v450_v48 = vmul.f32 %v387_v47, %v240_v43  ;;  %v451_v49 = vmul.f32 %v387_v47, %v241_v44  ;;  %v448_v51 = vmul.f32 %v382_v50, %v238_v45  ;;  %v449_v52 = vmul.f32 %v382_v50, %v239_v46 }
  0xcb   : > { %511 = vst [vmem:[%s681_s22 + $0x1c0] sm:$0xff] %v450_v48 }
  0xcc   : > { %512 = vst.msk [vmem:[%s681_s22 + $0x1c8] sm:$0xff] %vm455_vm0, %v451_v49 }
  0xcd   : > { %509 = vst [vmem:[%s681_s22 + $0x1b0] sm:$0xff] %v448_v51 }
  0xce   : > { %510 = vst.msk [vmem:[%s681_s22 + $0x1b8] sm:$0xff] %vm455_vm0, %v449_v52 }
  0xcf PF: > { %s12_s9 = sadd.s32 1, %s606_s9  }
  0xd0   : > { %p9_p4 = scmp.ge.s32.totalorder %s12_s9, 4  }
  0xd2   :  { %11 = sbr.rel (!%p9_p4) target bundleno = 1 (0x1), region = 59 }

</bundles_post_ra>
